<compile_context>
chip_gen: v7x
topology: tpu7x:2x2x1
jax: 0.10.0
libtpu: 0.0.40
codegen_flags: <defaults>
</compile_context>

<pallas_src>
from functools import partial

import jax
import jax.numpy as jnp
from jax.experimental import pallas as pl
from jax.experimental.pallas import tpu as pltpu


def stsc_kernel(x_hbm, w_dw_ref, w_at_ref, b_at_ref, w_lin_ref, out_ref,
                xp_ref, sem, *, batch):
    """Fused STSC forward on one time tile of the (T*B, N) slab.

    x_hbm:     (T*B, N)               full input, left in HBM (pl.ANY)
    w_dw_ref:  (K_conv, N)            depthwise temporal-conv weights, tap-major
    w_at_ref:  (K_at*N, R)            attention conv weights, tap-major stacked
    b_at_ref:  (1, R)                 attention conv bias
    w_lin_ref: (R, N)                 attention linear weights (pre-transposed)
    out_ref:   (TT*B, N)              gated output tile
    xp_ref:    ((TT+2*pad_conv)*B, N) VMEM scratch: time-padded tile window
    sem:       DMA semaphores (3,)
    """
    TTB, N = out_ref.shape
    B = batch
    K_conv = w_dw_ref.shape[0]
    KN, R = w_at_ref.shape
    K_at = KN // N
    pad_conv = (K_conv - 1) // 2
    pad_at = (K_at - 1) // 2
    halo = pad_conv * B                       # rows of time halo on each side

    ti = pl.program_id(0)
    nt = pl.num_programs(0)
    row0 = ti * TTB                           # first row of this tile in (T*B, N)

    left_valid = ti > 0
    right_valid = ti < nt - 1

    def copy(src_row, dst_row, nrows, slot):
        return pltpu.make_async_copy(
            x_hbm.at[pl.ds(src_row, nrows), :],
            xp_ref.at[pl.ds(dst_row, nrows), :],
            sem.at[slot])

    # Core rows: one contiguous HBM->VMEM DMA straight into the padded scratch.
    copy(row0, halo, TTB, 0).start()

    # Left / right time halos: re-fetch from HBM on interior tiles.
    @pl.when(left_valid)
    def _():
        copy(row0 - halo, 0, halo, 1).start()

    @pl.when(right_valid)
    def _():
        copy(row0 + TTB, halo + TTB, halo, 2).start()

    # Zero ONLY the pad bands, and only on the time-boundary tiles.
    @pl.when(jnp.logical_not(left_valid))
    def _():
        xp_ref[0:halo, :] = jnp.zeros((halo, N), xp_ref.dtype)

    @pl.when(jnp.logical_not(right_valid))
    def _():
        xp_ref[halo + TTB:2 * halo + TTB, :] = jnp.zeros((halo, N), xp_ref.dtype)

    # Wait for the DMAs we actually issued.
    copy(row0, halo, TTB, 0).wait()

    @pl.when(left_valid)
    def _():
        copy(row0 - halo, 0, halo, 1).wait()

    @pl.when(right_valid)
    def _():
        copy(row0 + TTB, halo + TTB, halo, 2).wait()

    # ---- STSC_Temporal_Conv: depthwise conv over time (groups=N, no bias). ----
    # Elementwise per tap -> VPU broadcasted multiply-adds; weights loaded once.
    wdw = w_dw_ref[...]                                     # (K_conv, N)
    conv_out = xp_ref[0:TTB, :] * wdw[0:1, :]
    for k in range(1, K_conv):
        conv_out = conv_out + xp_ref[k * B:k * B + TTB, :] * wdw[k:k + 1, :]

    # ---- STSC_Attention: K_at accumulated per-tap MXU matmuls (no im2col). ----
    off = (pad_conv - pad_at) * B
    acc = jnp.dot(xp_ref[off:off + TTB, :], w_at_ref[0:N, :],
                  preferred_element_type=jnp.float32)       # (TTB, R)
    for k in range(1, K_at):
        acc = acc + jnp.dot(xp_ref[off + k * B:off + k * B + TTB, :],
                            w_at_ref[k * N:(k + 1) * N, :],
                            preferred_element_type=jnp.float32)
    h = jnp.maximum(acc + b_at_ref[...], 0.0)               # bias + ReLU
    y = jnp.dot(h, w_lin_ref[...], preferred_element_type=jnp.float32)  # (TTB, N)
    d = jax.nn.sigmoid(-y)                                  # == 1 - sigmoid(y)

    # Gate: y_seq = temporal_conv(x) * D, one lane-dense store per tile.
    out_ref[...] = (conv_out * d).astype(out_ref.dtype)


def stsc_forward(x_seq, w_dw, w_at, b_at, w_lin, *, time_tile=None):
    """x_seq: [T, B, N] -> y_seq: [T, B, N] (matches the PyTorch STSC module)."""
    T, B, N = x_seq.shape
    K_conv = w_dw.shape[2]               # (N, 1, K_conv)
    R, _, K_at = w_at.shape              # (R, N, K_at)
    pad_conv = (K_conv - 1) // 2

    # Pick a time-tile: largest divisor of T with ~<=512 rows per tile whose
    # row-block is sublane aligned (or the whole T).
    if time_tile is None:
        target_tt = max(1, 512 // max(B, 1))
        time_tile = T
        best = None
        for tt in range(1, T + 1):
            if T % tt == 0 and tt <= target_tt and (tt == T or (tt * B) % 8 == 0):
                best = tt
        if best is not None:
            time_tile = best
    TT = time_tile
    assert T % TT == 0, "time_tile must divide T"
    assert TT == T or (TT * B) % 8 == 0, "row tile must be a multiple of 8"
    nt = T // TT

    # Weight prep (tiny tensors only - no activation-sized HBM round trips).
    w_dw2 = jnp.transpose(w_dw[:, 0, :], (1, 0))                     # (K_conv, N)
    w_at_flat = jnp.transpose(w_at, (2, 1, 0)).reshape(K_at * N, R)  # (K_at*N, R)
    b2 = b_at.reshape(1, R)                                          # (1, R)
    w_lin_t = jnp.transpose(w_lin)                                   # (R, N)

    # [T, B, N] -> (T*B, N): contiguous, free reshape (no transpose, no pad).
    x2 = x_seq.reshape(T * B, N)

    # VMEM budget: padded scratch + double-buffered output tile + temps + weights.
    itemsize = jnp.dtype(x_seq.dtype).itemsize
    tile_rows = TT * B
    xp_rows = (TT + 2 * pad_conv) * B
    est = (itemsize * (xp_rows * N + 2 * tile_rows * N)
           + 4 * (8 * tile_rows * max(N, R))
           + 4 * (K_conv * N + K_at * N * R + R + R * N))
    vmem_limit_bytes = int(min(96 * 2**20, max(16 * 2**20, 2 * est)))

    out = pl.pallas_call(
        partial(stsc_kernel, batch=B),
        out_shape=jax.ShapeDtypeStruct((T * B, N), x_seq.dtype),
        grid=(nt,),
        in_specs=[
            pl.BlockSpec(memory_space=pl.ANY),                   # x stays in HBM
            pl.BlockSpec((K_conv, N), lambda i: (0, 0)),
            pl.BlockSpec((K_at * N, R), lambda i: (0, 0)),
            pl.BlockSpec((1, R), lambda i: (0, 0)),
            pl.BlockSpec((R, N), lambda i: (0, 0)),
        ],
        out_specs=pl.BlockSpec((TT * B, N), lambda i: (i, 0)),
        scratch_shapes=[
            pltpu.VMEM((xp_rows, N), x_seq.dtype),
            pltpu.SemaphoreType.DMA((3,)),
        ],
        compiler_params=pltpu.CompilerParams(
            dimension_semantics=("parallel",),
            vmem_limit_bytes=vmem_limit_bytes),
    )(x2, w_dw2, w_at_flat, b2, w_lin_t)

    return out.reshape(T, B, N)


def stsc_reference(x_seq, w_dw, w_at, b_at, w_lin):
    """Pure-JAX reference mirroring the PyTorch ops (for verification)."""
    T, B, N = x_seq.shape
    K_conv = w_dw.shape[2]
    K_at = w_at.shape[2]
    pad_conv = (K_conv - 1) // 2
    pad_at = (K_at - 1) // 2

    x_t = jnp.transpose(x_seq, (1, 2, 0))                 # [B, N, T]

    # STSC_Temporal_Conv: depthwise Conv1d (groups=N, no bias)
    conv = jax.lax.conv_general_dilated(
        x_t, w_dw, window_strides=(1,), padding=[(pad_conv, pad_conv)],
        dimension_numbers=("NCH", "OIH", "NCH"), feature_group_count=N)  # [B, N, T]
    x_conv = jnp.transpose(conv, (2, 0, 1))               # [T, B, N]

    # STSC_Attention
    h = jax.lax.conv_general_dilated(
        x_t, w_at, window_strides=(1,), padding=[(pad_at, pad_at)],
        dimension_numbers=("NCH", "OIH", "NCH"))          # [B, R, T]
    h = h + b_at[None, :, None]
    h = jnp.maximum(jnp.transpose(h, (0, 2, 1)), 0.0)     # [B, T, R]
    y = h @ w_lin.T                                       # [B, T, N]
    d = 1.0 - jax.nn.sigmoid(y)
    d = jnp.transpose(d, (1, 0, 2))                       # [T, B, N]

    return x_conv * d


if __name__ == "__main__":
    # STSC defaults: dimension=2, time_rf_conv=5, time_rf_at=3, reduction=1
    T, B, N = 8, 4, 32
    time_rf_conv, time_rf_at, reduction = 5, 3, 1
    R = N // reduction

    key = jax.random.PRNGKey(0)
    k1, k2, k3, k4, kx = jax.random.split(key, 5)
    w_dw = jax.random.normal(k1, (N, 1, time_rf_conv), jnp.float32) * 0.2   # Conv1d depthwise
    w_at = jax.random.normal(k2, (R, N, time_rf_at), jnp.float32) * 0.1     # Conv1d N->R
    b_at = jax.random.normal(k3, (R,), jnp.float32) * 0.1                   # Conv1d bias
    w_lin = jax.random.normal(k4, (N, R), jnp.float32) * 0.1                # Linear R->N
    x_seq = jax.random.normal(kx, (T, B, N), jnp.float32)                   # [T, B, N]

    # time_tile=2 -> grid of 4 tiles, exercising left/interior/right halo paths.
    out = jax.block_until_ready(
        stsc_forward(x_seq, w_dw, w_at, b_at, w_lin, time_tile=2))

    ref = stsc_reference(x_seq, w_dw, w_at, b_at, w_lin)
    assert out.shape == ref.shape, (out.shape, ref.shape)
    assert jnp.allclose(out, ref, atol=1e-4, rtol=1e-4), "mismatch vs reference"

    print("KERNEL_OK")
</pallas_src>

<mosaic_0001>
module attributes {stable_mosaic.version = 11 : i64} {
  func.func @stsc_kernel(%arg0: i32, %arg1: memref<32x32xf32, #tpu.memory_space<any>>, %arg2: memref<5x32xf32, #tpu.memory_space<vmem>>, %arg3: memref<96x32xf32, #tpu.memory_space<vmem>>, %arg4: memref<1x32xf32, #tpu.memory_space<vmem>>, %arg5: memref<32x32xf32, #tpu.memory_space<vmem>>, %arg6: memref<8x32xf32, #tpu.memory_space<vmem>>, %arg7: memref<24x32xf32, #tpu.memory_space<vmem>>, %arg8: memref<3x!tpu.dma_semaphore, #tpu.memory_space<semaphore_mem>>) attributes {dimension_semantics = [#tpu.dimension_semantics<parallel>], iteration_bounds = array<i64: 4>, scalar_prefetch = 0 : i64, scratch_operands = 2 : i64, tpu.core_type = #tpu.core_type<tc>, window_params = [{}, {pipeline_mode = #tpu.pipeline_mode<synchronous>, transform_indices = @transform_1, window_bounds = array<i64: 5, 32>}, {pipeline_mode = #tpu.pipeline_mode<synchronous>, transform_indices = @transform_2, window_bounds = array<i64: 96, 32>}, {pipeline_mode = #tpu.pipeline_mode<synchronous>, transform_indices = @transform_3, window_bounds = array<i64: 1, 32>}, {pipeline_mode = #tpu.pipeline_mode<synchronous>, transform_indices = @transform_4, window_bounds = array<i64: 32, 32>}, {transform_indices = @transform_5, window_bounds = array<i64: 8, 32>}]} {
    %c8_i32 = arith.constant 8 : i32
    %0 = arith.muli %arg0, %c8_i32 : i32
    %c0_i32 = arith.constant 0 : i32
    %1 = arith.cmpi sgt, %arg0, %c0_i32 : i32
    %c3_i32 = arith.constant 3 : i32
    %2 = arith.cmpi slt, %arg0, %c3_i32 : i32
    %c0_i32_0 = arith.constant 0 : i32
    %c0_i32_1 = arith.constant 0 : i32
    %3 = tpu.memref_slice %arg1[%0, %c0_i32_1] : memref<32x32xf32, #tpu.memory_space<any>> -> memref<8x32xf32, #tpu.memory_space<any>>
    %c8_i32_2 = arith.constant 8 : i32
    %c0_i32_3 = arith.constant 0 : i32
    %4 = tpu.memref_slice %arg7[%c8_i32_2, %c0_i32_3] : memref<24x32xf32, #tpu.memory_space<vmem>> -> memref<8x32xf32, #tpu.memory_space<vmem>>
    %5 = tpu.memref_slice %arg8[%c0_i32_0] : memref<3x!tpu.dma_semaphore, #tpu.memory_space<semaphore_mem>> -> memref<1x!tpu.dma_semaphore, #tpu.memory_space<semaphore_mem>>
    %6 = tpu.memref_squeeze %5 : memref<1x!tpu.dma_semaphore, #tpu.memory_space<semaphore_mem>> -> memref<!tpu.dma_semaphore, #tpu.memory_space<semaphore_mem>>
    tpu.enqueue_dma source(%3 : memref<8x32xf32, #tpu.memory_space<any>>) target(%4 : memref<8x32xf32, #tpu.memory_space<vmem>>) target_semaphore(%6 : memref<!tpu.dma_semaphore, #tpu.memory_space<semaphore_mem>>)
    %7 = arith.extui %1 : i1 to i32
    %c0_i32_4 = arith.constant 0 : i32
    %8 = arith.cmpi ne, %7, %c0_i32_4 : i32
    scf.if %8 {
      %c8_i32_44 = arith.constant 8 : i32
      %77 = arith.subi %0, %c8_i32_44 : i32
      %c1_i32 = arith.constant 1 : i32
      %c0_i32_45 = arith.constant 0 : i32
      %78 = tpu.memref_slice %arg1[%77, %c0_i32_45] : memref<32x32xf32, #tpu.memory_space<any>> -> memref<8x32xf32, #tpu.memory_space<any>>
      %c0_i32_46 = arith.constant 0 : i32
      %c0_i32_47 = arith.constant 0 : i32
      %79 = tpu.memref_slice %arg7[%c0_i32_46, %c0_i32_47] : memref<24x32xf32, #tpu.memory_space<vmem>> -> memref<8x32xf32, #tpu.memory_space<vmem>>
      %80 = tpu.memref_slice %arg8[%c1_i32] : memref<3x!tpu.dma_semaphore, #tpu.memory_space<semaphore_mem>> -> memref<1x!tpu.dma_semaphore, #tpu.memory_space<semaphore_mem>>
      %81 = tpu.memref_squeeze %80 : memref<1x!tpu.dma_semaphore, #tpu.memory_space<semaphore_mem>> -> memref<!tpu.dma_semaphore, #tpu.memory_space<semaphore_mem>>
      tpu.enqueue_dma source(%78 : memref<8x32xf32, #tpu.memory_space<any>>) target(%79 : memref<8x32xf32, #tpu.memory_space<vmem>>) target_semaphore(%81 : memref<!tpu.dma_semaphore, #tpu.memory_space<semaphore_mem>>)
    } else {
    }
    %9 = arith.extui %2 : i1 to i32
    %c0_i32_5 = arith.constant 0 : i32
    %10 = arith.cmpi ne, %9, %c0_i32_5 : i32
    scf.if %10 {
      %c8_i32_44 = arith.constant 8 : i32
      %77 = arith.addi %0, %c8_i32_44 : i32
      %c2_i32 = arith.constant 2 : i32
      %c0_i32_45 = arith.constant 0 : i32
      %78 = tpu.memref_slice %arg1[%77, %c0_i32_45] : memref<32x32xf32, #tpu.memory_space<any>> -> memref<8x32xf32, #tpu.memory_space<any>>
      %c16_i32 = arith.constant 16 : i32
      %c0_i32_46 = arith.constant 0 : i32
      %79 = tpu.memref_slice %arg7[%c16_i32, %c0_i32_46] : memref<24x32xf32, #tpu.memory_space<vmem>> -> memref<8x32xf32, #tpu.memory_space<vmem>>
      %80 = tpu.memref_slice %arg8[%c2_i32] : memref<3x!tpu.dma_semaphore, #tpu.memory_space<semaphore_mem>> -> memref<1x!tpu.dma_semaphore, #tpu.memory_space<semaphore_mem>>
      %81 = tpu.memref_squeeze %80 : memref<1x!tpu.dma_semaphore, #tpu.memory_space<semaphore_mem>> -> memref<!tpu.dma_semaphore, #tpu.memory_space<semaphore_mem>>
      tpu.enqueue_dma source(%78 : memref<8x32xf32, #tpu.memory_space<any>>) target(%79 : memref<8x32xf32, #tpu.memory_space<vmem>>) target_semaphore(%81 : memref<!tpu.dma_semaphore, #tpu.memory_space<semaphore_mem>>)
    } else {
    }
    %true = arith.constant true
    %11 = arith.xori %1, %true : i1
    %12 = arith.extui %11 : i1 to i32
    %c0_i32_6 = arith.constant 0 : i32
    %13 = arith.cmpi ne, %12, %c0_i32_6 : i32
    scf.if %13 {
      %cst_44 = arith.constant 0.000000e+00 : f32
      %77 = vector.broadcast %cst_44 : f32 to vector<8x32xf32>
      %c0_45 = arith.constant 0 : index
      %c0_46 = arith.constant 0 : index
      %78 = vector.load %arg7[%c0_45, %c0_46] : memref<24x32xf32, #tpu.memory_space<vmem>>, vector<8x32xf32>
      tpu.vector_store %arg7[%c0_45, %c0_46], %77 {strides = array<i32>} : memref<24x32xf32, #tpu.memory_space<vmem>>, vector<8x32xf32>,
    } else {
    }
    %true_7 = arith.constant true
    %14 = arith.xori %2, %true_7 : i1
    %15 = arith.extui %14 : i1 to i32
    %c0_i32_8 = arith.constant 0 : i32
    %16 = arith.cmpi ne, %15, %c0_i32_8 : i32
    scf.if %16 {
      %cst_44 = arith.constant 0.000000e+00 : f32
      %77 = vector.broadcast %cst_44 : f32 to vector<8x32xf32>
      %c16_45 = arith.constant 16 : index
      %c0_46 = arith.constant 0 : index
      %78 = vector.load %arg7[%c16_45, %c0_46] : memref<24x32xf32, #tpu.memory_space<vmem>>, vector<8x32xf32>
      tpu.vector_store %arg7[%c16_45, %c0_46], %77 {strides = array<i32>} : memref<24x32xf32, #tpu.memory_space<vmem>>, vector<8x32xf32>,
    } else {
    }
    %c0_i32_9 = arith.constant 0 : i32
    %c0_i32_10 = arith.constant 0 : i32
    %17 = tpu.memref_slice %arg1[%0, %c0_i32_10] : memref<32x32xf32, #tpu.memory_space<any>> -> memref<8x32xf32, #tpu.memory_space<any>>
    %c8_i32_11 = arith.constant 8 : i32
    %c0_i32_12 = arith.constant 0 : i32
    %18 = tpu.memref_slice %arg7[%c8_i32_11, %c0_i32_12] : memref<24x32xf32, #tpu.memory_space<vmem>> -> memref<8x32xf32, #tpu.memory_space<vmem>>
    %19 = tpu.memref_slice %arg8[%c0_i32_9] : memref<3x!tpu.dma_semaphore, #tpu.memory_space<semaphore_mem>> -> memref<1x!tpu.dma_semaphore, #tpu.memory_space<semaphore_mem>>
    %20 = tpu.memref_squeeze %19 : memref<1x!tpu.dma_semaphore, #tpu.memory_space<semaphore_mem>> -> memref<!tpu.dma_semaphore, #tpu.memory_space<semaphore_mem>>
    tpu.wait_dma2 semaphore(%20 : memref<!tpu.dma_semaphore, #tpu.memory_space<semaphore_mem>>) src(%17 : memref<8x32xf32, #tpu.memory_space<any>>) dst(%18 : memref<8x32xf32, #tpu.memory_space<vmem>>)
    %21 = arith.extui %1 : i1 to i32
    %c0_i32_13 = arith.constant 0 : i32
    %22 = arith.cmpi ne, %21, %c0_i32_13 : i32
    scf.if %22 {
      %c8_i32_44 = arith.constant 8 : i32
      %77 = arith.subi %0, %c8_i32_44 : i32
      %c1_i32 = arith.constant 1 : i32
      %c0_i32_45 = arith.constant 0 : i32
      %78 = tpu.memref_slice %arg1[%77, %c0_i32_45] : memref<32x32xf32, #tpu.memory_space<any>> -> memref<8x32xf32, #tpu.memory_space<any>>
      %c0_i32_46 = arith.constant 0 : i32
      %c0_i32_47 = arith.constant 0 : i32
      %79 = tpu.memref_slice %arg7[%c0_i32_46, %c0_i32_47] : memref<24x32xf32, #tpu.memory_space<vmem>> -> memref<8x32xf32, #tpu.memory_space<vmem>>
      %80 = tpu.memref_slice %arg8[%c1_i32] : memref<3x!tpu.dma_semaphore, #tpu.memory_space<semaphore_mem>> -> memref<1x!tpu.dma_semaphore, #tpu.memory_space<semaphore_mem>>
      %81 = tpu.memref_squeeze %80 : memref<1x!tpu.dma_semaphore, #tpu.memory_space<semaphore_mem>> -> memref<!tpu.dma_semaphore, #tpu.memory_space<semaphore_mem>>
      tpu.wait_dma2 semaphore(%81 : memref<!tpu.dma_semaphore, #tpu.memory_space<semaphore_mem>>) src(%78 : memref<8x32xf32, #tpu.memory_space<any>>) dst(%79 : memref<8x32xf32, #tpu.memory_space<vmem>>)
    } else {
    }
    %23 = arith.extui %2 : i1 to i32
    %c0_i32_14 = arith.constant 0 : i32
    %24 = arith.cmpi ne, %23, %c0_i32_14 : i32
    scf.if %24 {
      %c8_i32_44 = arith.constant 8 : i32
      %77 = arith.addi %0, %c8_i32_44 : i32
      %c2_i32 = arith.constant 2 : i32
      %c0_i32_45 = arith.constant 0 : i32
      %78 = tpu.memref_slice %arg1[%77, %c0_i32_45] : memref<32x32xf32, #tpu.memory_space<any>> -> memref<8x32xf32, #tpu.memory_space<any>>
      %c16_i32 = arith.constant 16 : i32
      %c0_i32_46 = arith.constant 0 : i32
      %79 = tpu.memref_slice %arg7[%c16_i32, %c0_i32_46] : memref<24x32xf32, #tpu.memory_space<vmem>> -> memref<8x32xf32, #tpu.memory_space<vmem>>
      %80 = tpu.memref_slice %arg8[%c2_i32] : memref<3x!tpu.dma_semaphore, #tpu.memory_space<semaphore_mem>> -> memref<1x!tpu.dma_semaphore, #tpu.memory_space<semaphore_mem>>
      %81 = tpu.memref_squeeze %80 : memref<1x!tpu.dma_semaphore, #tpu.memory_space<semaphore_mem>> -> memref<!tpu.dma_semaphore, #tpu.memory_space<semaphore_mem>>
      tpu.wait_dma2 semaphore(%81 : memref<!tpu.dma_semaphore, #tpu.memory_space<semaphore_mem>>) src(%78 : memref<8x32xf32, #tpu.memory_space<any>>) dst(%79 : memref<8x32xf32, #tpu.memory_space<vmem>>)
    } else {
    }
    %c0 = arith.constant 0 : index
    %c0_15 = arith.constant 0 : index
    %25 = vector.load %arg2[%c0, %c0_15] : memref<5x32xf32, #tpu.memory_space<vmem>>, vector<5x32xf32>
    %c0_16 = arith.constant 0 : index
    %c0_17 = arith.constant 0 : index
    %26 = vector.load %arg7[%c0_16, %c0_17] : memref<24x32xf32, #tpu.memory_space<vmem>>, vector<8x32xf32>
    %27 = vector.extract_strided_slice %25 {offsets = [0, 0], sizes = [1, 32], strides = [1, 1]} : vector<5x32xf32> to vector<1x32xf32>
    %28 = vector.broadcast %27 : vector<1x32xf32> to vector<8x32xf32>
    %29 = arith.mulf %26, %28 : vector<8x32xf32>
    %c4 = arith.constant 4 : index
    %c0_18 = arith.constant 0 : index
    %30 = vector.load %arg7[%c4, %c0_18] : memref<24x32xf32, #tpu.memory_space<vmem>>, vector<8x32xf32>
    %31 = vector.extract_strided_slice %25 {offsets = [1, 0], sizes = [1, 32], strides = [1, 1]} : vector<5x32xf32> to vector<1x32xf32>
    %32 = vector.broadcast %31 : vector<1x32xf32> to vector<8x32xf32>
    %33 = arith.mulf %30, %32 : vector<8x32xf32>
    %34 = arith.addf %29, %33 : vector<8x32xf32>
    %c8 = arith.constant 8 : index
    %c0_19 = arith.constant 0 : index
    %35 = vector.load %arg7[%c8, %c0_19] : memref<24x32xf32, #tpu.memory_space<vmem>>, vector<8x32xf32>
    %36 = vector.extract_strided_slice %25 {offsets = [2, 0], sizes = [1, 32], strides = [1, 1]} : vector<5x32xf32> to vector<1x32xf32>
    %37 = vector.broadcast %36 : vector<1x32xf32> to vector<8x32xf32>
    %38 = arith.mulf %35, %37 : vector<8x32xf32>
    %39 = arith.addf %34, %38 : vector<8x32xf32>
    %c12 = arith.constant 12 : index
    %c0_20 = arith.constant 0 : index
    %40 = vector.load %arg7[%c12, %c0_20] : memref<24x32xf32, #tpu.memory_space<vmem>>, vector<8x32xf32>
    %41 = vector.extract_strided_slice %25 {offsets = [3, 0], sizes = [1, 32], strides = [1, 1]} : vector<5x32xf32> to vector<1x32xf32>
    %42 = vector.broadcast %41 : vector<1x32xf32> to vector<8x32xf32>
    %43 = arith.mulf %40, %42 : vector<8x32xf32>
    %44 = arith.addf %39, %43 : vector<8x32xf32>
    %c16 = arith.constant 16 : index
    %c0_21 = arith.constant 0 : index
    %45 = vector.load %arg7[%c16, %c0_21] : memref<24x32xf32, #tpu.memory_space<vmem>>, vector<8x32xf32>
    %46 = vector.extract_strided_slice %25 {offsets = [4, 0], sizes = [1, 32], strides = [1, 1]} : vector<5x32xf32> to vector<1x32xf32>
    %47 = vector.broadcast %46 : vector<1x32xf32> to vector<8x32xf32>
    %48 = arith.mulf %45, %47 : vector<8x32xf32>
    %49 = arith.addf %44, %48 : vector<8x32xf32>
    %c4_22 = arith.constant 4 : index
    %c0_23 = arith.constant 0 : index
    %50 = vector.load %arg7[%c4_22, %c0_23] : memref<24x32xf32, #tpu.memory_space<vmem>>, vector<8x32xf32>
    %c0_24 = arith.constant 0 : index
    %c0_25 = arith.constant 0 : index
    %51 = vector.load %arg3[%c0_24, %c0_25] : memref<96x32xf32, #tpu.memory_space<vmem>>, vector<32x32xf32>
    %cst = arith.constant dense<0.000000e+00> : vector<8x32xf32>
    %52 = tpu.matmul %50, %51, %cst {dimension_numbers = #tpu.dot_dimension_numbers<[1], [0], [0], [1], [0, 0, 1, 1], [], []>} : vector<8x32xf32>, vector<32x32xf32>, vector<8x32xf32> -> vector<8x32xf32>
    %c8_26 = arith.constant 8 : index
    %c0_27 = arith.constant 0 : index
    %53 = vector.load %arg7[%c8_26, %c0_27] : memref<24x32xf32, #tpu.memory_space<vmem>>, vector<8x32xf32>
    %c32 = arith.constant 32 : index
    %c0_28 = arith.constant 0 : index
    %54 = vector.load %arg3[%c32, %c0_28] : memref<96x32xf32, #tpu.memory_space<vmem>>, vector<32x32xf32>
    %cst_29 = arith.constant dense<0.000000e+00> : vector<8x32xf32>
    %55 = tpu.matmul %53, %54, %cst_29 {dimension_numbers = #tpu.dot_dimension_numbers<[1], [0], [0], [1], [0, 0, 1, 1], [], []>} : vector<8x32xf32>, vector<32x32xf32>, vector<8x32xf32> -> vector<8x32xf32>
    %56 = arith.addf %52, %55 : vector<8x32xf32>
    %c12_30 = arith.constant 12 : index
    %c0_31 = arith.constant 0 : index
    %57 = vector.load %arg7[%c12_30, %c0_31] : memref<24x32xf32, #tpu.memory_space<vmem>>, vector<8x32xf32>
    %c64 = arith.constant 64 : index
    %c0_32 = arith.constant 0 : index
    %58 = vector.load %arg3[%c64, %c0_32] : memref<96x32xf32, #tpu.memory_space<vmem>>, vector<32x32xf32>
    %cst_33 = arith.constant dense<0.000000e+00> : vector<8x32xf32>
    %59 = tpu.matmul %57, %58, %cst_33 {dimension_numbers = #tpu.dot_dimension_numbers<[1], [0], [0], [1], [0, 0, 1, 1], [], []>} : vector<8x32xf32>, vector<32x32xf32>, vector<8x32xf32> -> vector<8x32xf32>
    %60 = arith.addf %56, %59 : vector<8x32xf32>
    %c0_34 = arith.constant 0 : index
    %c0_35 = arith.constant 0 : index
    %61 = vector.load %arg4[%c0_34, %c0_35] : memref<1x32xf32, #tpu.memory_space<vmem>>, vector<1x32xf32>
    %62 = vector.broadcast %61 : vector<1x32xf32> to vector<8x32xf32>
    %63 = arith.addf %60, %62 : vector<8x32xf32>
    %cst_36 = arith.constant 0.000000e+00 : f32
    %64 = vector.broadcast %cst_36 : f32 to vector<8x32xf32>
    %65 = arith.maximumf %63, %64 : vector<8x32xf32>
    %c0_37 = arith.constant 0 : index
    %c0_38 = arith.constant 0 : index
    %66 = vector.load %arg5[%c0_37, %c0_38] : memref<32x32xf32, #tpu.memory_space<vmem>>, vector<32x32xf32>
    %cst_39 = arith.constant dense<0.000000e+00> : vector<8x32xf32>
    %67 = tpu.matmul %65, %66, %cst_39 {dimension_numbers = #tpu.dot_dimension_numbers<[1], [0], [0], [1], [0, 0, 1, 1], [], []>} : vector<8x32xf32>, vector<32x32xf32>, vector<8x32xf32> -> vector<8x32xf32>
    %cst_40 = arith.constant 0.000000e+00 : f32
    %68 = vector.broadcast %cst_40 : f32 to vector<8x32xf32>
    %69 = arith.subf %68, %67 : vector<8x32xf32>
    %70 = arith.negf %69 : vector<8x32xf32>
    %71 = math.exp %70 : vector<8x32xf32>
    %cst_41 = arith.constant 1.000000e+00 : f32
    %72 = vector.broadcast %cst_41 : f32 to vector<8x32xf32>
    %73 = arith.addf %72, %71 : vector<8x32xf32>
    %74 = arith.divf %72, %73 : vector<8x32xf32>
    %75 = arith.mulf %49, %74 : vector<8x32xf32>
    %c0_42 = arith.constant 0 : index
    %c0_43 = arith.constant 0 : index
    %76 = vector.load %arg6[%c0_42, %c0_43] : memref<8x32xf32, #tpu.memory_space<vmem>>, vector<8x32xf32>
    tpu.vector_store %arg6[%c0_42, %c0_43], %75 {strides = array<i32>} : memref<8x32xf32, #tpu.memory_space<vmem>>, vector<8x32xf32>,
    return
  }
  func.func @transform_1(%arg0: i32) -> (i32, i32) {
    %c0_i32 = arith.constant 0 : i32
    %c0_i32_0 = arith.constant 0 : i32
    %c0_i32_1 = arith.constant 0 : i32
    return %c0_i32, %c0_i32_0 : i32, i32
  }
  func.func @transform_2(%arg0: i32) -> (i32, i32) {
    %c0_i32 = arith.constant 0 : i32
    %c0_i32_0 = arith.constant 0 : i32
    %c0_i32_1 = arith.constant 0 : i32
    return %c0_i32, %c0_i32_0 : i32, i32
  }
  func.func @transform_3(%arg0: i32) -> (i32, i32) {
    %c0_i32 = arith.constant 0 : i32
    %c0_i32_0 = arith.constant 0 : i32
    %c0_i32_1 = arith.constant 0 : i32
    return %c0_i32, %c0_i32_0 : i32, i32
  }
  func.func @transform_4(%arg0: i32) -> (i32, i32) {
    %c0_i32 = arith.constant 0 : i32
    %c0_i32_0 = arith.constant 0 : i32
    %c0_i32_1 = arith.constant 0 : i32
    return %c0_i32, %c0_i32_0 : i32, i32
  }
  func.func @transform_5(%arg0: i32) -> (i32, i32) {
    %c0_i32 = arith.constant 0 : i32
    %c0_i32_0 = arith.constant 0 : i32
    return %arg0, %c0_i32 : i32, i32
  }
}

</mosaic_0001>

<bundles_post_ra>
// kernel: tpu_custom_call.1
= control target key start
LH: loop header
LB: loop body
LE: loop exit
PB: predicated region body
PF: predicated region fallthrough
CT: control target
= control target key end

     0   :  { %10 = vsyncpa [#allocation5], 0  ;;  %s1310_s0 = inlined_call_operand.vmem [shape: f32[32,32], index: 0, kind: input, shape index: {}]   ;;  %s1311_s1 = inlined_call_operand.vmem [shape: f32[5,32], index: 1, kind: input, shape index: {}]   ;;  %s1312_s2 = inlined_call_operand.vmem [shape: f32[96,32], index: 2, kind: input, shape index: {}]   ;;  %s1313_s3 = inlined_call_operand.vmem [shape: f32[1,32], index: 3, kind: input, shape index: {}]   ;;  %s1314_s4 = inlined_call_operand.vmem [shape: f32[32,32], index: 4, kind: input, shape index: {}]   ;;  %s1315_s5 = inlined_call_operand.hbm [shape: f32[32,32], index: 5, kind: output, shape index: {}]  }
   0x1   :  { %12 = vsyncpa [#allocation5 + $0x1], 0  ;;  %s1102_s18 = smov 0   ;;  %s1104_s19 = smov 0  }
   0x2   :  { %s1106_s20 = smov 0   ;;  %s1108_s21 = smov 0  }
   0x3 LB: > { %s1123_s22 = sadd.s32 4294967295, %s1064_s21   ;;  %s822_s23 = sadd.s32 4294967294, %s1064_s21   ;;  %s1064_s21 = sphi %s1108_s21, %s1321_s21   ;;  %s1060_s20 = sphi %s1106_s20, %s1320_s20   ;;  %s1056_s19 = sphi %s1104_s19, %s1319_s19   ;;  %s1052_s18 = sphi %s1102_s18, %s1318_s18  }
   0x4   : > { %s1127_s24 = sadd.s32 1, %s1064_s21   ;;  %s109_s25 = sadd.s32 1, %s1060_s20 }
   0x5   : > { %s106_s26 = ssub.s32 %s1064_s21, %s1127_s24  ;;  %p119_p0 = scmp.ne.s32.totalorder %s1060_s20, %s1056_s19 }
   0x6   : > { %p107_p1 = scmp.eq.s32.totalorder %s106_s26, 0  ;;  %p120_p2 = scmp.eq.s32.totalorder %s1123_s22, 3 }
   0x7   : > { %p125_p3 = scmp.ne.s32.totalorder %s1056_s19, %s1052_s18  ;;  %p126_p4 = scmp.eq.s32.totalorder %s822_s23, 3 }
   0x8   : > { %s1138_s27 = scalar_select %p107_p1, %s1060_s20, %s109_s25  }
   0x9   : > { %p1140_p5 = por %p120_p2, %p119_p0  ;;  %p1144_p6 = por %p126_p4, %p125_p3 }
   0xa   : > { %p824_p7 = scmp.ge.s32.totalorder %s1064_s21, 1  ;;  %p156_p8 = scmp.lt.s32.totalorder %s1064_s21, 5 }
   0xc   : > { %p157_p9 = pnand %p824_p7, %p156_p8 }
   0xd   : > { %s174_s30 = sand.u32 (!%p157_p9), 1, %s1056_s19   ;;  %s826_s6 = sshll.u32 (!%p157_p9), %s1123_s22, 3 }
   0xe   : > { %160 = sbr.rel (%p157_p9) target bundleno = 557 (0x22d), region = 36  ;;  %s1154_s7 = sshll.u32 (!%p157_p9), %s174_s30, 3 }
   0xf   : > { %s180_s10 = scalar_lea.vmem (!%p157_p9), %s1310_s0, %s826_s6  ;;  %s176_s11 = scalar_lea.vmem (!%p157_p9), [#allocation4], %s1154_s7 }
  0x10   : > { %v214_v0 = vld [vmem:[%s180_s10] sm:$0xff] (!%p157_p9) }
  0x11   : > { %215 = vst [vmem:[#allocation2 + $0x8] sm:$0xff] (!%p157_p9), %v214_v0 }
  0x15   : > { %223 = vsyncadd [#allocation3], 128  ;;  %p827_p10 = scmp.le.s32.totalorder %s1123_s22, 0 }
  0x16   : > { %s828_s12 = sadd.s32 (!%p827_p10), 4294967288, %s826_s6 }
  0x17   : > { %226 = sbr.rel (%p827_p10) target bundleno = 31 (0x1f), region = 74  ;;  %s228_s15 = scalar_lea.vmem (!%p827_p10), %s1310_s0, %s828_s12 }
  0x18   : > { %v262_v1 = vld [vmem:[%s228_s15] sm:$0xff] (!%p827_p10) }
  0x19   : > { %263 = vst [vmem:[#allocation2] sm:$0xff] (!%p827_p10), %v262_v1 }
  0x1e   : > { %271 = vsyncadd [#allocation3 + $0x1], 128 }
  0x1f PF: > { %p829_p11 = scmp.ge.s32.totalorder %s1123_s22, 3 }
  0x20   : > { %v831_v2 = vld [vmem:[%s180_s10 + $0x8] sm:$0xff] (!%p829_p11) }
  0x21   : > { %274 = sbr.rel (%p829_p11) target bundleno = 41 (0x29), region = 112  ;;  %312 = vst [vmem:[#allocation2 + $0x10] sm:$0xff] (!%p829_p11), %v831_v2 }
  0x28   : > { %320 = vsyncadd [#allocation3 + $0x2], 128 }
  0x29 PF: > { %p833_p12 = scmp.gt.s32.totalorder %s1123_s22, 0 }
  0x2a   : > { %vm325_vm0 = vcmask (!%p833_p12), 261120   ;;  %v1066_v3 = vmov (!%p833_p12), 0.0  }
  0x2b   : > { %324 = sbr.rel (%p833_p12) target bundleno = 50 (0x32), region = 150  ;;  %326 = vst.msk [vmem:[#allocation2] sm:$0xff] (!%p833_p12), %vm325_vm0, %v1066_v3 }
  0x32 PF: > { %p834_p13 = scmp.lt.s32.totalorder %s1123_s22, 3 }
  0x33   : > { %vm331_vm1 = vcmask (!%p834_p13), 261120   ;;  %v1067_v4 = vmov (!%p834_p13), 0.0  }
  0x34   : > { %330 = sbr.rel (%p834_p13) target bundleno = 59 (0x3b), region = 154  ;;  %332 = vst.msk [vmem:[#allocation2 + $0x10] sm:$0xff] (!%p834_p13), %vm331_vm1, %v1067_v4 }
  0x3b PF: > { %1036 = dma.done.wait [#allocation3], 128 }
  0x3c   : > { %1037 = vsyncadd [#allocation3], 4294967168 }
  0x3d   : > { %1039 = dma.done.wait (%p833_p12), [#allocation3 + $0x1], 128 }
  0x3e   : > { %1041 = vsyncadd (%p833_p12), [#allocation3 + $0x1], 4294967168 }
  0x3f   : > { %1043 = dma.done.wait (%p834_p13), [#allocation3 + $0x2], 128 }
  0x40   : > { %1045 = vsyncadd (%p834_p13), [#allocation3 + $0x2], 4294967168  ;;  %v350_v5 = vlaneseq  ;;  %v1068_v6 = vmov 0.0|0.0   ;;  %vm1069_vm2 = vmmov 0   ;;  %v1070_v7 = vmov 0.0   ;;  %v387_v12 = vld [vmem:[%s1312_s2 + $0x20] sm:$0xff] }
  0x41   : > { %914 = vmatprep.subr.bf16.mxu0 %v1068_v6  ;;  %920 = vmatprep.subr.bf16.mxu1 %v1068_v6  ;;  %v388_v13 = vld [vmem:[%s1312_s2 + $0x28] sm:$0xff]  ;;  %v383_v14 = vld [vmem:[%s1312_s2] sm:$0xff]  ;;  %v389_v18 = vld [vmem:[%s1312_s2 + $0x30] sm:$0xff]  ;;  %vm391_vm3 = vcmask 261120   ;;  %s844_s13 = sshll.u32 %s1123_s22, 7  ;;  %s725_s14 = sshll.u32 %s176_s11, 4  ;;  %s1265_s14 = int_to_ptr.vmem [resolvable:$true] %s725_s14 }
  0x42   : > { %878 = vmatprep.mubr.msk.f32.mxu0 %vm1069_vm2, %v1070_v7  ;;  %v1176_v8 = vshrl.u32 %v350_v5, 7  ;;  %889 = vmatprep.mubr.msk.f32.mxu1 %vm1069_vm2, %v1070_v7  ;;  %v915_v16 = vpack.c.bf16 %v388_v13, %v387_v12  ;;  %v384_v17 = vld [vmem:[%s1312_s2 + $0x8] sm:$0xff]  ;;  %v390_v19 = vld [vmem:[%s1312_s2 + $0x38] sm:$0xff]  ;;  %v385_v21 = vld [vmem:[%s1312_s2 + $0x10] sm:$0xff]  ;;  %s1263_s17 = scalar_lea.hbm %s1315_s5, %s844_s13  ;;  %s712_s23 = scalar_lea.sflag [#allocation5], %s174_s30 }
  0x43   : > { %v921_v20 = vpack.c.bf16 %v384_v17, %v383_v14  ;;  %v386_v22 = vld [vmem:[%s1312_s2 + $0x18] sm:$0xff]  ;;  %v1210_v23 = vld [vmem:[%s1311_s1] sm:$0x1f]  ;;  %v918_v24 = vpack.c.bf16 %v390_v19, %v389_v18  ;;  %v362_v25 = vld [vmem:[#allocation2 + $0x8] sm:$0xff]  ;;  %s992_s22 = scalar_lea.vmem %s1265_s14, 128  ;;  %s1071_s25 = smov [#allocation4]  }
  0x44   : > { %v365_v9 = vsub.s32 2, %v1176_v8  ;;  %v352_v10 = vsub.s32 0, %v1176_v8  ;;  %v358_v11 = vsub.s32 1, %v1176_v8  ;;  %v372_v15 = vsub.s32 3, %v1176_v8  ;;  %916 = vmatpush3.bf16.msra.mxu0 %v915_v16  ;;  %v349_v27 = vld [vmem:[#allocation2] sm:$0xff]  ;;  %v539_v33 = vld [vmem:[%s1312_s2 + $0x48] sm:$0xff]  ;;  %p993_p0 = scmp.ne.s32.totalorder %s1265_s14, %s992_s22 }
  0x45   : > { %922 = vmatpush3.bf16.msra.mxu1 %v921_v20  ;;  %917 = vmatprep.subr.bf16.mxu0 %v1068_v6  ;;  %v924_v30 = vpack.c.bf16 %v386_v22, %v385_v21  ;;  %v355_v31 = vld [vmem:[#allocation2 + $0x4] sm:$0xff]  ;;  %v369_v38 = vld [vmem:[#allocation2 + $0xc] sm:$0xff]  ;;  %v541_v43 = vld [vmem:[%s1312_s2 + $0x58] sm:$0xff]  ;;  %v379_v4 = vsub.s32 4, %v1176_v8  ;;  %s996_s26 = sshll.u32 %s1071_s25, 4  ;;  %s997_s26 = int_to_ptr.vmem [resolvable:$false] %s996_s26 }
  0x46   : > { %v366_v26 = vrot.slane %v1210_v23, %v365_v9  ;;  %v353_v28 = vrot.slane %v1210_v23, %v352_v10  ;;  %v359_v29 = vrot.slane %v1210_v23, %v358_v11  ;;  %v538_v32 = vld [vmem:[%s1312_s2 + $0x40] sm:$0xff]  ;;  %v373_v34 = vrot.slane %v1210_v23, %v372_v15  ;;  %923 = vmatprep.subr.bf16.mxu1 %v1068_v6  ;;  %v540_v42 = vld [vmem:[%s1312_s2 + $0x50] sm:$0xff]  ;;  %v626_v48 = vld [vmem:[%s1314_s4 + $0x8] sm:$0xff]  ;;  %p994_p1 = pnand %p993_p0, %p1140_p5  ;;  %s998_s6 = scalar_lea.vmem %s997_s26, 256 }
  0x47   : > { %v927_v40 = vpack.c.bf16 %v539_v33, %v538_v32  ;;  %v930_v45 = vpack.c.bf16 %v541_v43, %v540_v42  ;;  %v625_v47 = vld [vmem:[%s1314_s4] sm:$0xff]  ;;  %v627_v50 = vld [vmem:[%s1314_s4 + $0x10] sm:$0xff]  ;;  %v628_v51 = vld [vmem:[%s1314_s4 + $0x18] sm:$0xff]  ;;  %p999_p3 = scmp.lt.s32.totalorder %s1265_s14, %s997_s26  ;;  %p1000_p4 = scmp.lt.s32.totalorder %s998_s6, %s992_s22 }
  0x48   : > { %v367_v35 = vmul.f32 %v366_v26, %v362_v25  ;;  %v354_v36 = vmul.f32 %v353_v28, %v349_v27  ;;  %v360_v37 = vmul.f32 %v359_v29, %v355_v31  ;;  %919 = vmatpush3.bf16.msra.mxu0 %v918_v24  ;;  %v374_v41 = vmul.f32 %v373_v34, %v369_v38  ;;  %v840_v59 = vld [vmem:[%s1313_s3] ss:$0 sm:$0xff]  ;;  %v376_v9 = vld [vmem:[#allocation2 + $0x10] sm:$0xff]  ;;  %p995_p2 = pneg %p994_p1 }
  0x49   : > { %925 = vmatpush3.bf16.msra.mxu1 %v924_v30  ;;  %926 = vmatprep.subr.bf16.mxu0 %v1068_v6  ;;  %v933_v49 = vpack.c.bf16 %v626_v48, %v625_v47  ;;  %v936_v52 = vpack.c.bf16 %v628_v51, %v627_v50  ;;  %p1001_p7 = por %p1000_p4, %p999_p3 }
  0x4a   : > { %v361_v39 = vadd.f32 %v360_v37, %v354_v36  ;;  %932 = vmatprep.subr.bf16.mxu1 %v1068_v6 }
  0x4b   : > { %879 = vmatmul.mubr.msk.f32.vlgmr.msra.gmra.mrb[0].mxu0 %vm391_vm3, %v362_v25  ;;  %p1002_p8 = pnand %p1001_p7, %p995_p2 }
  0x4c   : > { %v368_v44 = vadd.f32 %v367_v35, %v361_v39  ;;  %890 = vmatmul.mubr.msk.f32.vlgmr.msra.gmra.mrb[0].mxu1 %vm391_vm3, %v355_v31  ;;  %928 = vmatpush3.bf16.msra.mxu0 %v927_v40 }
  0x4d   : > { %929 = vmatprep.subr.bf16.mxu0 %v1068_v6  ;;  %900 = vmatprep.mubr.msk.f32.mxu0 %vm1069_vm2, %v1070_v7 }
  0x4e   : > { %v375_v46 = vadd.f32 %v374_v41, %v368_v44  ;;  %911 = vmatprep.mubr.msk.f32.mxu1 %vm1069_vm2, %v1070_v7  ;;  %934 = vmatpush3.bf16.msra.mxu1 %v933_v49  ;;  %v380_v7 = vrot.slane %v1210_v23, %v379_v4 }
  0x4f   : > { %935 = vmatprep.subr.bf16.mxu1 %v1068_v6 }
  0x50   : > { %931 = vmatpush3.bf16.msra.mxu0 %v930_v45  ;;  %v381_v10 = vmul.f32 %v380_v7, %v376_v9 }
  0x52   : > { %937 = vmatpush3.bf16.msra.mxu1 %v936_v52  ;;  %v382_v11 = vadd.f32 %v381_v10, %v375_v46 }
  0x53   : > { %901 = vmatmul.mubr.msk.f32.vlgmr.msra.gmra.mrb[2].mxu0 %vm391_vm3, %v369_v38 }
 0x11e   : > { %v461_v53 = vpop.f32.mrb[0].mxu0 }
 0x11f   : > { %v880_v54 = vpop.f32.mrb[1].mxu0  ;;  %v534_v55 = vpop.f32.mrb[0].mxu1 }
 0x120   : > { %v535_v56 = vadd.f32 %v534_v55, %v461_v53  ;;  %v891_v57 = vpop.f32.mrb[1].mxu1 }
 0x126   : > { %v611_v58 = vpop.f32.mrb[2].mxu0 }
 0x127   : > { %v615_v60 = vadd.f32 %v611_v58, %v535_v56  ;;  %v902_v61 = vpop.f32.mrb[3].mxu0 }
 0x129   : > { %v623_v62 = vadd.f32 %v840_v59, %v615_v60 }
 0x12b   : > { %v624_v63 = vmax.f32 %v623_v62, 0.0 }
 0x12d   : > { %912 = vmatmul.mubr.msk.f32.vlgmr.msra.gmra.mrb[2].mxu1 %vm391_vm3, %v624_v63 }
 0x200   : > { %v698_v0 = vpop.f32.mrb[2].mxu1 }
 0x201   : > { %v702_v1 = vsub.f32 0.0, %v698_v0  ;;  %v913_v2 = vpop.f32.mrb[3].mxu1 }
 0x203   : > { %v842_v3 = vmul.f32 -1.442695, %v702_v1 }
 0x205   : > { %988 = vpow2.f32 %v842_v3 }
 0x20f   : > { %v989_v5 = vpop.eup %988 }
 0x210   : > { %v706_v6 = vadd.f32 1.0, %v989_v5 }
 0x212   : > { %990 = vrcp.f32 %v706_v6 }
 0x21c   : > { %v991_v12 = vpop.eup %990 }
 0x21d   : > { %v709_v13 = vmul.f32 %v991_v12, %v382_v11 }
 0x21f   : > { %710 = vst.msk [vmem:[%s176_s11] sm:$0xff] %vm391_vm3, %v709_v13 }
 0x220   : > { %1005 = shalt.err (!%p1002_p8)
}
 0x221   : > { %s1006_s30 = scalar_lea.hbm %s1263_s17, 128  ;;  %s1010_s8 = scalar_lea.hbm %s1315_s5, 512 }
 0x222   : > { %p1007_p9 = scmp.ne.s32.totalorder %s1263_s17, %s1006_s30  ;;  %p1011_p12 = scmp.lt.u32.totalorder %s1263_s17, %s1315_s5 }
 0x223   : > { %p1012_p13 = scmp.lt.u32.totalorder %s1010_s8, %s1006_s30  ;;  %p1014_p1 = scmp.lt.u32.totalorder %s1006_s30, %s1263_s17 }
 0x224   : > { %p1008_p10 = pnand %p1007_p9, %p1140_p5 }
 0x225   : > { %p1013_p0 = por %p1012_p13, %p1011_p12 }
 0x226   : > { %p1009_p11 = pneg %p1008_p10 }
 0x227   : > { %p1015_p2 = por %p1014_p1, %p1013_p0 }
 0x229   : > { %p1016_p3 = pnand %p1015_p2, %p1009_p11 }
 0x22b   : > { %1019 = shalt.err (!%p1016_p3)
}
 0x22c   : > { %942 = dma.vmem_to_hbm [thread:$0]  (%p1140_p5), %s1265_s14, 128, %s1263_s17, %s712_s23  }
 0x22d PF: > { %p950_p4 = scmp.ge.s32.totalorder %s1064_s21, 2  ;;  %s737_s12 = sand.u32 1, %s1052_s18  }
 0x22e   : > { %s738_s13 = scalar_lea.sflag [#allocation5], %s737_s12 }
 0x22f   : > { %p945_p7 = pnand %p950_p4, %p1144_p6 }
 0x231   : > { %1047 = dma.done.wait (!%p945_p7), %s738_s13, 128  }
 0x232   : > { %1049 = vsyncadd (!%p945_p7), %s738_s13, 4294967168  ;;  %p15_p8 = scmp.ge.s32.totalorder %s1127_s24, 6   ;;  %s1318_s18 = smov %s1056_s19 }
 0x233   : > { %s1319_s19 = smov %s1060_s20  ;;  %s1320_s20 = smov %s1138_s27 }
 0x234   : > { %s1321_s21 = smov %s1127_s24  ;;  %17 = sbr.rel (!%p15_p8) target bundleno = 3 (0x3), region = 229 }
 0x23b   :  { %743 = vsyncpa [#allocation5], 1 }
 0x23c   :  { %745 = vsyncpa [#allocation5 + $0x1], 1 }
 0x23d   :  { %746 = vsyncmov [#allocation3] }
 0x240   :  { %s747_s21 = vpop.sfrf %746 }
 0x241   :  { %p847_p5 = scmp.ne.s32.totalorder %s747_s21, 0 }
 0x243   :  { %751 = shalt.err (%p847_p5)  }
 0x244   :  { %753 = vsyncmov [#allocation3 + $0x1] }
 0x247   :  { %s754_s28 = vpop.sfrf %753 }
 0x248   :  { %p848_p6 = scmp.ne.s32.totalorder %s754_s28, 0 }
 0x24a   :  { %758 = shalt.err (%p848_p6)  }
 0x24b   :  { %760 = vsyncmov [#allocation3 + $0x2] }
 0x24e   :  { %s761_s29 = vpop.sfrf %760 }
 0x24f   :  { %p849_p9 = scmp.ne.s32.totalorder %s761_s29, 0 }
 0x251   :  { %765 = shalt.err (%p849_p9)  }

</bundles_post_ra>
